<compile_context>
chip_gen: v7x
topology: tpu7x:2x2x1
jax: 0.10.0
libtpu: 0.0.40
codegen_flags: <defaults>
</compile_context>

<pallas_src>
import functools

import jax
import jax.numpy as jnp
from jax.experimental import pallas as pl
from jax.experimental.pallas import tpu as pltpu


def _round_up(x, m):
    return (x + m - 1) // m * m


def _pick_tile(dim, pref, align):
    """Largest tile <= pref (stepping by align) that divides dim; else full dim."""
    if dim <= pref:
        return dim
    t = (pref // align) * align
    while t >= align:
        if dim % t == 0:
            return t
        t -= align
    return dim


def _vmem_capacity():
    try:
        return int(pltpu.get_tpu_info().vmem_capacity_bytes)
    except Exception:
        return 64 << 20          # conservative (v7x per-core VMEM)


def _vmem_limit(need_bytes, vmem_cap):
    lim = max(need_bytes * 2 + (4 << 20), 32 << 20)
    lim = min(lim, int(vmem_cap * 0.8))
    return int(max(lim, need_bytes + (2 << 20)))


def _derive_t_block(T, Bs, Hp, vmem_cap):
    """Pick t_block in {8,16,32}: fits VMEM budget, minimizes padded Tp, then maximizes size."""
    budget = int(vmem_cap * 0.5)
    best, best_tp = 8, None
    for tb in (8, 16, 32):
        need = (2 * tb * Bs * 4 * Hp * 2      # gx blocks (bf16, double-buffered)
                + 2 * tb * Bs * Hp * 2        # h_out blocks (bf16, double-buffered)
                + 2 * Hp * 4 * Hp * 2         # W_hh (bf16) -- double-buffer accounted
                + 2 * Bs * Hp * 4)            # h/c f32 scratch
        if need > budget:
            continue
        tp = _round_up(T, tb)
        if best_tp is None or tp < best_tp or (tp == best_tp and tb > best):
            best, best_tp = tb, tp
    return best


# ----------------------------------------------------------------------------
# Generic tiled matmul + bias (input projection): bf16 operands, f32 accumulate.
# ----------------------------------------------------------------------------
def _matmul_bias_kernel(x_ref, w_ref, b_ref, o_ref):
    o_ref[...] = (jnp.dot(x_ref[...], w_ref[...],
                          preferred_element_type=jnp.float32)
                  + b_ref[...]).astype(o_ref.dtype)


def _matmul_bias(x, w, b, out_dtype, vmem_cap):
    """(M, K) @ (K, N) + (1, N) -> (M, N). Grid order streams the larger operand once."""
    M, K = x.shape
    N = w.shape[1]
    tm = _pick_tile(M, 512, 8)
    tn = _pick_tile(N, 512, 128)

    x_bytes = x.size * x.dtype.itemsize
    w_bytes = w.size * w.dtype.itemsize
    if w_bytes >= x_bytes:
        # weight axis on the slow (outer) grid dim -> whole W is DMA'd from HBM once.
        grid = (N // tn, M // tm)
        in_specs = [pl.BlockSpec((tm, K), lambda j, i: (i, 0)),
                    pl.BlockSpec((K, tn), lambda j, i: (0, j)),
                    pl.BlockSpec((1, tn), lambda j, i: (0, j))]
        out_spec = pl.BlockSpec((tm, tn), lambda j, i: (i, j))
    else:
        grid = (M // tm, N // tn)
        in_specs = [pl.BlockSpec((tm, K), lambda i, j: (i, 0)),
                    pl.BlockSpec((K, tn), lambda i, j: (0, j)),
                    pl.BlockSpec((1, tn), lambda i, j: (0, j))]
        out_spec = pl.BlockSpec((tm, tn), lambda i, j: (i, j))

    need = (2 * (tm * K * x.dtype.itemsize + K * tn * w.dtype.itemsize
                 + tn * b.dtype.itemsize)
            + 2 * tm * tn * jnp.dtype(out_dtype).itemsize)

    return pl.pallas_call(
        _matmul_bias_kernel,
        out_shape=jax.ShapeDtypeStruct((M, N), out_dtype),
        grid_spec=pltpu.PrefetchScalarGridSpec(
            num_scalar_prefetch=0, grid=grid,
            in_specs=in_specs, out_specs=out_spec),
        compiler_params=pltpu.CompilerParams(
            dimension_semantics=("parallel", "parallel"),
            vmem_limit_bytes=_vmem_limit(need, vmem_cap)),
    )(x, w, b)


# ----------------------------------------------------------------------------
# LSTM recurrence: t_block timesteps per grid step; only h @ W_hh^T lives here.
# grid = (batch_shards ["parallel", for v7x dual-TC], time blocks ["arbitrary"]).
# ----------------------------------------------------------------------------
def _lstm_recurrence_kernel(gx_ref, whh_ref, hout_ref, h_ref, c_ref, *,
                            hidden_pad, t_block):
    @pl.when(pl.program_id(1) == 0)          # start of each batch shard's time loop
    def _():
        h_ref[...] = jnp.zeros_like(h_ref)
        c_ref[...] = jnp.zeros_like(c_ref)

    Hp = hidden_pad

    def step(i, carry):
        h_prev = h_ref[...]                  # f32 carry
        c_prev = c_ref[...]
        # x-projection + bias precomputed (bf16 stream); only the recurrent matmul here.
        # W_hh read inside the loop: MXU operands stream from VMEM, avoids vreg spills.
        gates = (gx_ref[i].astype(jnp.float32)
                 + jnp.dot(h_prev.astype(jnp.bfloat16), whh_ref[...],
                           preferred_element_type=jnp.float32))
        # PyTorch gate order [i, f, g, o]; slices are 128-lane aligned (Hp). f32 gate math.
        i_g = jax.nn.sigmoid(gates[:, 0 * Hp:1 * Hp])
        f_g = jax.nn.sigmoid(gates[:, 1 * Hp:2 * Hp])
        g_g = jnp.tanh(gates[:, 2 * Hp:3 * Hp])
        o_g = jax.nn.sigmoid(gates[:, 3 * Hp:4 * Hp])
        c_new = f_g * c_prev + i_g * g_g
        h_new = o_g * jnp.tanh(c_new)
        c_ref[...] = c_new
        h_ref[...] = h_new
        hout_ref[i] = h_new.astype(hout_ref.dtype)   # bf16 writeback; fc hoisted out
        return carry

    jax.lax.fori_loop(0, t_block, step, None, unroll=True)
    # TODO(synk): weight-stationary MXU driving (pltpu.matmul_push_rhs / matmul_acc_lhs)
    # if profiling shows the per-step weight push dominating the recurrence.


# ----------------------------------------------------------------------------
# Output projection: (tt, Bp, Hp) time-major h  ->  (Bp, tt, Vt) BATCH-MAJOR logits.
# Vocab axis is the outer grid dim so W_fc (the largest weight) streams from HBM once.
# ----------------------------------------------------------------------------
def _fc_proj_kernel(h_ref, w_ref, b_ref, o_ref):
    tt, bp, hp = h_ref.shape
    h2 = h_ref[...].reshape(tt * bp, hp)                     # contiguous merge (bp % 8 == 0)
    acc = jnp.dot(h2, w_ref[...], preferred_element_type=jnp.float32) + b_ref[...]
    for t in range(tt):                                      # static: batch-major scatter in VMEM
        o_ref[:, t, :] = acc[t * bp:(t + 1) * bp, :].astype(o_ref.dtype)


# ----------------------------------------------------------------------------
# Forward wrapper
# ----------------------------------------------------------------------------
def decoder_rnn_forward(features, captions, params, *, t_block=None):
    """features: (B, E) f32; captions: (B, T) int32 -> logits (B, T, V) f32."""
    embed_tbl = params["embed"]          # (V, E)
    w_ih_t = params["w_ih_t"]            # (E, 4H)  == W_ih.T
    w_hh_t = params["w_hh_t"]            # (H, 4H)  == W_hh.T
    b_gate = params["b_gate"]            # (1, 4H)  == b_ih + b_hh
    w_fc_t = params["w_fc_t"]            # (H, V)   == W_fc.T
    b_fc = params["b_fc"]                # (1, V)

    B, E = features.shape
    H = w_hh_t.shape[0]
    V = w_fc_t.shape[1]
    T = captions.shape[1]                # 1 (features step) + (T-1) caption steps

    Hp = _round_up(H, 128)               # lane-align each gate block
    Vp = _round_up(V, 128)               # lane-dense logits stores
    Bp = _round_up(B, 8)                 # sublane-dense rows

    vmem_cap = _vmem_capacity()

    # Batch shards: lets v7x's two TensorCores split the serial recurrence.
    n_bshard = 2 if (Bp % 16 == 0) else 1
    Bs = Bp // n_bshard

    if t_block is None:
        t_block = _derive_t_block(T, Bs, Hp, vmem_cap)
    Tp = _round_up(T, t_block)

    # --- glue (plain JAX): build x TIME-MAJOR directly (gather in (T,B) order), so no
    #     HBM transpose of the float activation is ever materialized. -------------------
    caps = captions[:, :-1]
    emb_tm = jnp.take(embed_tbl, jnp.transpose(caps), axis=0)        # (T-1, B, E)
    x_tm = jnp.concatenate([features[None, :, :], emb_tm], axis=0)   # (T,   B, E)
    x_tm = jnp.pad(x_tm, ((0, Tp - T), (0, Bp - B), (0, 0)))         # (Tp, Bp, E)
    x2 = x_tm.reshape(Tp * Bp, E).astype(jnp.bfloat16)               # free reshape + bf16 cast
    # TODO(synk): fuse the embedding gather into the input-projection kernel via
    # scalar-prefetched caption ids + pl.Element row-gather BlockSpec on embed_tbl.

    # --- pad parameters: per-gate lane padding to Hp; V -> Vp; bf16 matmul operands ----
    def pad_gate_cols(a):
        parts = [jnp.pad(a[..., k * H:(k + 1) * H],
                         [(0, 0)] * (a.ndim - 1) + [(0, Hp - H)])
                 for k in range(4)]
        return jnp.concatenate(parts, axis=-1)

    w_ih_p = pad_gate_cols(w_ih_t).astype(jnp.bfloat16)                    # (E, 4Hp)
    w_hh_p = jnp.pad(pad_gate_cols(w_hh_t),
                     ((0, Hp - H), (0, 0))).astype(jnp.bfloat16)           # (Hp, 4Hp)
    b_gate_p = pad_gate_cols(b_gate)                                       # (1, 4Hp) f32
    w_fc_p = jnp.pad(w_fc_t, ((0, Hp - H), (0, Vp - V))).astype(jnp.bfloat16)  # (Hp, Vp)
    b_fc_p = jnp.pad(b_fc, ((0, 0), (0, Vp - V)))                          # (1, Vp) f32

    # --- (1) batched input projection (no sequential dependence), bf16 gx stream -------
    gx = _matmul_bias(x2, w_ih_p, b_gate_p, jnp.bfloat16, vmem_cap)        # (Tp*Bp, 4Hp) bf16
    gx = gx.reshape(Tp, Bp, 4 * Hp)                                        # time-major, free

    # --- (2) sequential LSTM recurrence --------------------------------------------------
    rec_need = (2 * t_block * Bs * 4 * Hp * 2       # gx blocks (bf16, double-buffered)
                + 2 * t_block * Bs * Hp * 2         # h_out blocks
                + 2 * Hp * 4 * Hp * 2               # W_hh double-buffer accounted (bf16)
                + 2 * Bs * Hp * 4)                  # h/c f32 scratch
    # TODO(synk): pipeline_mode=pl.Buffered(1) on the loop-invariant W_hh BlockSpec once
    # single-buffering is verified on the target JAX version; budgeted as double-buffered.
    kernel = functools.partial(_lstm_recurrence_kernel,
                               hidden_pad=Hp, t_block=t_block)
    h_out = pl.pallas_call(
        kernel,
        out_shape=jax.ShapeDtypeStruct((Tp, Bp, Hp), jnp.bfloat16),
        grid_spec=pltpu.PrefetchScalarGridSpec(
            num_scalar_prefetch=0,
            grid=(n_bshard, Tp // t_block),
            in_specs=[
                pl.BlockSpec((t_block, Bs, 4 * Hp), lambda b, t: (t, b, 0)),  # gx
                pl.BlockSpec((Hp, 4 * Hp), lambda b, t: (0, 0)),              # W_hh^T
            ],
            out_specs=pl.BlockSpec((t_block, Bs, Hp), lambda b, t: (t, b, 0)),
            scratch_shapes=[
                pltpu.VMEM((Bs, Hp), jnp.float32),       # h carry (f32)
                pltpu.VMEM((Bs, Hp), jnp.float32),       # c carry (f32)
            ],
        ),
        compiler_params=pltpu.CompilerParams(
            dimension_semantics=("parallel", "arbitrary"),   # batch shards || ; time serial
            vmem_limit_bytes=_vmem_limit(rec_need, vmem_cap)),
    )(gx, w_hh_p)

    # --- (3) output projection, writes batch-major logits (no wrapper transpose) --------
    tt = t_block                                     # multiple of 8 -> valid out sublane dim
    tn = _pick_tile(Vp, 512, 128)
    fc_need = (2 * (tt * Bp * Hp * 2 + Hp * tn * 2 + tn * 4)
               + 2 * Bp * tt * tn * 4)
    logits = pl.pallas_call(
        _fc_proj_kernel,
        out_shape=jax.ShapeDtypeStruct((Bp, Tp, Vp), jnp.float32),
        grid_spec=pltpu.PrefetchScalarGridSpec(
            num_scalar_prefetch=0,
            grid=(Vp // tn, Tp // tt),               # vocab OUTER -> W_fc streamed once
            in_specs=[
                pl.BlockSpec((tt, Bp, Hp), lambda j, t: (t, 0, 0)),   # h (time-major, bf16)
                pl.BlockSpec((Hp, tn),     lambda j, t: (0, j)),      # W_fc^T (bf16)
                pl.BlockSpec((1, tn),      lambda j, t: (0, j)),      # b_fc (f32)
            ],
            out_specs=pl.BlockSpec((Bp, tt, tn), lambda j, t: (0, t, j)),
        ),
        compiler_params=pltpu.CompilerParams(
            dimension_semantics=("parallel", "parallel"),
            vmem_limit_bytes=_vmem_limit(fc_need, vmem_cap)),
    )(h_out, w_fc_p, b_fc_p)

    return logits[:B, :T, :V]                        # strip padding -> (B, T, V)


# ----------------------------------------------------------------------------
# Pure-JAX reference of the PyTorch forward (correctness check, f32)
# ----------------------------------------------------------------------------
def _reference_forward(features, captions, params):
    embed_tbl = params["embed"]
    w_ih_t, w_hh_t, b_gate = params["w_ih_t"], params["w_hh_t"], params["b_gate"]
    w_fc_t, b_fc = params["w_fc_t"], params["b_fc"]
    H = w_hh_t.shape[0]

    caps = captions[:, :-1]
    emb = jnp.take(embed_tbl, caps, axis=0)
    x = jnp.concatenate([features[:, None, :], emb], 1)   # (B, T, E)
    B, T, _ = x.shape

    def step(carry, x_t):
        h, c = carry
        g = x_t @ w_ih_t + h @ w_hh_t + b_gate
        i = jax.nn.sigmoid(g[:, 0 * H:1 * H])
        f = jax.nn.sigmoid(g[:, 1 * H:2 * H])
        gg = jnp.tanh(g[:, 2 * H:3 * H])
        o = jax.nn.sigmoid(g[:, 3 * H:4 * H])
        c = f * c + i * gg
        h = o * jnp.tanh(c)
        return (h, c), h

    h0 = jnp.zeros((B, H), jnp.float32)
    c0 = jnp.zeros((B, H), jnp.float32)
    _, hs = jax.lax.scan(step, (h0, c0), jnp.transpose(x, (1, 0, 2)))
    out = hs @ w_fc_t + b_fc                               # (T, B, V)
    return jnp.transpose(out, (1, 0, 2))


def init_params(key, embed_size, hidden_size, vocab_size):
    ks = jax.random.split(key, 7)
    E, H, V = embed_size, hidden_size, vocab_size
    scale = 0.1
    return {
        "embed": jax.random.normal(ks[0], (V, E), jnp.float32) * scale,
        "w_ih_t": jax.random.normal(ks[1], (E, 4 * H), jnp.float32) * scale,
        "w_hh_t": jax.random.normal(ks[2], (H, 4 * H), jnp.float32) * scale,
        "b_gate": (jax.random.normal(ks[3], (1, 4 * H), jnp.float32) * scale
                   + jax.random.normal(ks[4], (1, 4 * H), jnp.float32) * scale),
        "w_fc_t": jax.random.normal(ks[5], (H, V), jnp.float32) * scale,
        "b_fc": jax.random.normal(ks[6], (1, V), jnp.float32) * scale,
    }


if __name__ == "__main__":
    B, T_cap = 2, 8          # batch, caption length
    E, H, V = 32, 32, 64     # embed_size, hidden_size, vocab_size

    key = jax.random.PRNGKey(0)
    k_feat, k_cap, k_par = jax.random.split(key, 3)

    params = init_params(k_par, E, H, V)
    features = jax.random.normal(k_feat, (B, E), jnp.float32)
    captions = jax.random.randint(k_cap, (B, T_cap), 0, V, dtype=jnp.int32)

    out = decoder_rnn_forward(features, captions, params)
    out = jax.block_until_ready(out)

    ref = _reference_forward(features, captions, params)
    assert out.shape == (B, T_cap, V)
    # Tolerance loosened vs the f32 version: matmul operands / gx / h_out are bf16
    # (accumulation, gate math, h/c carry and logits remain f32).
    assert jnp.allclose(out, ref, atol=3e-2, rtol=3e-2), "mismatch vs reference"

    print("KERNEL_OK")
</pallas_src>

<mosaic_0001>
module attributes {stable_mosaic.version = 11 : i64} {
  func.func @_matmul_bias_kernel(%arg0: i32, %arg1: i32, %arg2: memref<64x32xbf16, #tpu.memory_space<vmem>>, %arg3: memref<32x512xbf16, #tpu.memory_space<vmem>>, %arg4: memref<1x512xf32, #tpu.memory_space<vmem>>, %arg5: memref<64x512xbf16, #tpu.memory_space<vmem>>) attributes {dimension_semantics = [#tpu.dimension_semantics<parallel>, #tpu.dimension_semantics<parallel>], iteration_bounds = array<i64: 1, 1>, scalar_prefetch = 0 : i64, scratch_operands = 0 : i64, tpu.core_type = #tpu.core_type<tc>, window_params = [{transform_indices = @transform_0, window_bounds = array<i64: 64, 32>}, {transform_indices = @transform_1, window_bounds = array<i64: 32, 512>}, {transform_indices = @transform_2, window_bounds = array<i64: 1, 512>}, {transform_indices = @transform_3, window_bounds = array<i64: 64, 512>}]} {
    %c0 = arith.constant 0 : index
    %c0_0 = arith.constant 0 : index
    %0 = vector.load %arg2[%c0, %c0_0] : memref<64x32xbf16, #tpu.memory_space<vmem>>, vector<64x32xbf16>
    %c0_1 = arith.constant 0 : index
    %c0_2 = arith.constant 0 : index
    %1 = vector.load %arg3[%c0_1, %c0_2] : memref<32x512xbf16, #tpu.memory_space<vmem>>, vector<32x512xbf16>
    %cst = arith.constant dense<0.000000e+00> : vector<64x512xf32>
    %2 = tpu.matmul %0, %1, %cst {dimension_numbers = #tpu.dot_dimension_numbers<[1], [0], [0], [1], [0, 0, 1, 1], [], []>} : vector<64x32xbf16>, vector<32x512xbf16>, vector<64x512xf32> -> vector<64x512xf32>
    %c0_3 = arith.constant 0 : index
    %c0_4 = arith.constant 0 : index
    %3 = vector.load %arg4[%c0_3, %c0_4] : memref<1x512xf32, #tpu.memory_space<vmem>>, vector<1x512xf32>
    %4 = vector.broadcast %3 : vector<1x512xf32> to vector<64x512xf32>
    %5 = arith.addf %2, %4 : vector<64x512xf32>
    %6 = arith.truncf %5 : vector<64x512xf32> to vector<64x512xbf16>
    %c0_5 = arith.constant 0 : index
    %c0_6 = arith.constant 0 : index
    %7 = vector.load %arg5[%c0_5, %c0_6] : memref<64x512xbf16, #tpu.memory_space<vmem>>, vector<64x512xbf16>
    tpu.vector_store %arg5[%c0_5, %c0_6], %6 {strides = array<i32>} : memref<64x512xbf16, #tpu.memory_space<vmem>>, vector<64x512xbf16>,
    return
  }
  func.func @transform_0(%arg0: i32, %arg1: i32) -> (i32, i32) {
    %c0_i32 = arith.constant 0 : i32
    %c0_i32_0 = arith.constant 0 : i32
    return %arg1, %c0_i32 : i32, i32
  }
  func.func @transform_1(%arg0: i32, %arg1: i32) -> (i32, i32) {
    %c0_i32 = arith.constant 0 : i32
    %c0_i32_0 = arith.constant 0 : i32
    return %c0_i32, %arg0 : i32, i32
  }
  func.func @transform_2(%arg0: i32, %arg1: i32) -> (i32, i32) {
    %c0_i32 = arith.constant 0 : i32
    %c0_i32_0 = arith.constant 0 : i32
    return %c0_i32, %arg0 : i32, i32
  }
  func.func @transform_3(%arg0: i32, %arg1: i32) -> (i32, i32) {
    %c0_i32 = arith.constant 0 : i32
    return %arg1, %arg0 : i32, i32
  }
}

</mosaic_0001>

<bundles_post_ra>
// kernel: tpu_custom_call.1
= control target key start
LH: loop header
LB: loop body
LE: loop exit
PB: predicated region body
PF: predicated region fallthrough
CT: control target
= control target key end

     0   :  { %8 = vsyncpa [#allocation3], 0  ;;  %s655_s0 = inlined_call_operand.vmem [shape: bf16[64,32], index: 0, kind: input, shape index: {}]   ;;  %s656_s1 = inlined_call_operand.hbm [shape: bf16[32,512], index: 1, kind: input, shape index: {}]   ;;  %s657_s2 = inlined_call_operand.vmem [shape: f32[1,512], index: 2, kind: input, shape index: {}]   ;;  %s658_s3 = inlined_call_operand.hbm [shape: bf16[64,512], index: 3, kind: output, shape index: {}]  }
   0x1   :  { %9 = vsyncpa [#allocation4], 0  ;;  %s537_s12 = smov [#allocation2]   ;;  %s489_s16 = scalar_lea.hbm %s656_s1, 1024 }
   0x2   :  { %s17_s13 = sshll.u32 %s537_s12, 4  ;;  %p490_p0 = scmp.ne.s32.totalorder %s656_s1, %s489_s16  ;;  %s18_s13 = int_to_ptr.vmem [resolvable:$true] %s17_s13 }
   0x3   :  { %p493_p1 = scmp.lt.u32.totalorder %s489_s16, %s656_s1 }
   0x5   :  { %p495_p2 = pnand %p493_p1, %p490_p0 }
   0x7   :  { %498 = shalt.err (!%p495_p2)
}
   0x8   :  { %s499_s21 = scalar_lea.vmem %s18_s13, 1024  ;;  %p504_p4 = scmp.lt.s32.totalorder %s18_s13, %s18_s13 }
   0x9   :  { %p500_p3 = scmp.ne.s32.totalorder %s18_s13, %s499_s21  ;;  %p505_p5 = scmp.lt.s32.totalorder %s499_s21, %s499_s21 }
   0xb   :  { %p506_p6 = por %p505_p5, %p504_p4 }
   0xd   :  { %p507_p7 = pnand %p506_p6, %p500_p3 }
   0xf   :  { %510 = shalt.err (!%p507_p7)
}
  0x10   :  { %s538_s22 = smov 256   ;;  %s539_s23 = smov 16  }
  0x11   :  { %23 = dma.hbm_to_vmem [thread:$0]  %s656_s1, 1024, %s18_s13, [#allocation3], %s538_s22, %s538_s22, %s539_s23  }
  0x12   :  { %533 = dma.done.wait [#allocation3], 1024  }
  0x13   :  { %534 = vsyncadd [#allocation3], 4294966272  ;;  %v540_v0 = vmov 0   ;;  %v473_v1 = vld [vmem:[#allocation2 + $0x4] ss:$16 sps:$4 sm:$0xff]   ;;  %vm128_vm0 = vcmask 261120   ;;  %v48_v13 = vlaneseq }
  0x14   :  { %173 = vmatprep.mubr.bf16.mxu0 %v540_v0  ;;  %246 = vmatprep.mubr.bf16.mxu1 %v540_v0  ;;  %v475_v2 = vld [vmem:[#allocation2 + $0xc] ss:$16 sps:$4 sm:$0xff]   ;;  %v477_v3 = vld [vmem:[#allocation2] ss:$16 sps:$4 sm:$0xff]   ;;  %v478_v4 = vld [vmem:[#allocation2 + $0x8] ss:$16 sps:$4 sm:$0xff]  }
  0x15   :  { %141 = vmatprep.subr.bf16.mxu0 %v473_v1  ;;  %214 = vmatprep.subr.bf16.mxu1 %v475_v2  ;;  %v479_v5 = vld [vmem:[#allocation2 + $0x24] ss:$16 sps:$4 sm:$0xff]   ;;  %v481_v6 = vld [vmem:[#allocation2 + $0x2c] ss:$16 sps:$4 sm:$0xff]   ;;  %v483_v7 = vld [vmem:[#allocation2 + $0x20] ss:$16 sps:$4 sm:$0xff]  }
  0x16   :  { %142 = vmatpush1.bf16.msra.mxu0 %v477_v3  ;;  %215 = vmatpush1.bf16.msra.mxu1 %v478_v4  ;;  %v484_v8 = vld [vmem:[#allocation2 + $0x28] ss:$16 sps:$4 sm:$0xff]   ;;  %v485_v9 = vld [vmem:[%s655_s0] sm:$0xff]   ;;  %v487_v11 = vld [vmem:[%s655_s0 + $0x10] sm:$0xff]   ;;  %v49_v14 = vshrl.u32 %v48_v13, 7 }
  0x17   :  { %143 = vmatprep.subr.bf16.mxu0 %v479_v5  ;;  %216 = vmatprep.subr.bf16.mxu1 %v481_v6  ;;  %v486_v10 = vld [vmem:[%s655_s0 + $0x8] sm:$0xff]   ;;  %v488_v12 = vld [vmem:[%s655_s0 + $0x18] sm:$0xff]   ;;  %v46_v17 = vld [vmem:[%s657_s2] sm:$0xf]  ;;  %s541_s0 = smov [#allocation5]  }
  0x18   :  { %v50_v15 = vsub.s32 0, %v49_v14  ;;  %v58_v16 = vsub.s32 2, %v49_v14  ;;  %v54_v18 = vsub.s32 1, %v49_v14  ;;  %v62_v19 = vsub.s32 3, %v49_v14  ;;  %s404_s2 = sshll.u32 %s541_s0, 4  ;;  %s405_s2 = int_to_ptr.vmem [resolvable:$true] %s404_s2 }
  0x19   :  { %s511_s8 = scalar_lea.vmem %s405_s2, 2048  ;;  %p516_p9 = scmp.lt.s32.totalorder %s405_s2, %s405_s2 }
  0x1a   :  { %144 = vmatpush1.bf16.msra.mxu0 %v483_v7  ;;  %217 = vmatpush1.bf16.msra.mxu1 %v484_v8  ;;  %v600_v20 = vrot.slane %v46_v17, %v50_v15  ;;  %v602_v21 = vrot.slane %v46_v17, %v58_v16  ;;  %v604_v22 = vrot.slane %v46_v17, %v54_v18  ;;  %p512_p8 = scmp.ne.s32.totalorder %s405_s2, %s511_s8  ;;  %p517_p10 = scmp.lt.s32.totalorder %s511_s8, %s511_s8 }
  0x1b   :  { %v606_v23 = vrot.slane %v46_v17, %v62_v19 }
  0x1c   :  { %p518_p11 = por %p517_p10, %p516_p9 }
  0x1d   :  { %428 = vmatmul.mubr.msk.bf16.vlgmr.msra.gmra.mrb[0].mxu0 %vm128_vm0, %v485_v9  ;;  %432 = vmatmul.mubr.msk.bf16.vlgmr.msra.gmra.mrb[0].mxu1 %vm128_vm0, %v485_v9 }
  0x1e   :  { %183 = vmatprep.mubr.bf16.mxu0 %v540_v0  ;;  %256 = vmatprep.mubr.bf16.mxu1 %v540_v0  ;;  %p519_p12 = pnand %p518_p11, %p512_p8 }
  0x25   :  { %429 = vmatmul.mubr.msk.bf16.gmra.mrb[4].mxu0 %vm128_vm0, %v486_v10  ;;  %433 = vmatmul.mubr.msk.bf16.gmra.mrb[4].mxu1 %vm128_vm0, %v486_v10 }
  0x26   :  { %193 = vmatprep.mubr.bf16.mxu0 %v540_v0  ;;  %266 = vmatprep.mubr.bf16.mxu1 %v540_v0 }
  0x2d   :  { %430 = vmatmul.mubr.msk.bf16.gmra.mrb[8].mxu0 %vm128_vm0, %v487_v11  ;;  %434 = vmatmul.mubr.msk.bf16.gmra.mrb[8].mxu1 %vm128_vm0, %v487_v11 }
  0x2e   :  { %203 = vmatprep.mubr.bf16.mxu0 %v540_v0  ;;  %276 = vmatprep.mubr.bf16.mxu1 %v540_v0 }
  0x35   :  { %431 = vmatmul.mubr.msk.bf16.gmra.mrb[12].mxu0 %vm128_vm0, %v488_v12  ;;  %435 = vmatmul.mubr.msk.bf16.gmra.mrb[12].mxu1 %vm128_vm0, %v488_v12 }
  0xf0   :  { %v175_v24 = vpop.f32.mrb[0].mxu0  ;;  %v248_v25 = vpop.f32.mrb[0].mxu1 }
  0xf1   :  { %v176_v26 = vadd.f32 %v175_v24, %v600_v20  ;;  %v249_v27 = vadd.f32 %v248_v25, %v602_v21  ;;  %v177_v28 = vpop.f32.mrb[1].mxu0  ;;  %v250_v29 = vpop.f32.mrb[1].mxu1 }
  0xf2   :  { %v178_v30 = vadd.f32 %v177_v28, %v604_v22  ;;  %v251_v31 = vadd.f32 %v250_v29, %v606_v23  ;;  %v179_v32 = vpop.f32.mrb[2].mxu0  ;;  %v252_v33 = vpop.f32.mrb[2].mxu1 }
  0xf3   :  { %v180_v34 = vadd.f32 %v179_v32, %v600_v20  ;;  %v253_v35 = vadd.f32 %v252_v33, %v602_v21  ;;  %v181_v36 = vpop.f32.mrb[3].mxu0  ;;  %v254_v37 = vpop.f32.mrb[3].mxu1 }
  0xf4   :  { %v452_v38 = vpack.c.bf16 %v178_v30, %v176_v26  ;;  %v453_v39 = vpack.c.bf16 %v251_v31, %v249_v27  ;;  %v182_v40 = vadd.f32 %v181_v36, %v604_v22  ;;  %v255_v41 = vadd.f32 %v254_v37, %v606_v23 }
  0xf6   :  { %383 = vst [vmem:[#allocation5] sm:$0xff] %v452_v38  ;;  %384 = vst [vmem:[#allocation5 + $0x8] sm:$0xff] %v453_v39  ;;  %v454_v42 = vpack.c.bf16 %v182_v40, %v180_v34  ;;  %v455_v43 = vpack.c.bf16 %v255_v41, %v253_v35 }
  0xf8   :  { %385 = vst [vmem:[#allocation5 + $0x10] sm:$0xff] %v454_v42  ;;  %386 = vst [vmem:[#allocation5 + $0x18] sm:$0xff] %v455_v43  ;;  %v185_v44 = vpop.f32.mrb[4].mxu0  ;;  %v258_v45 = vpop.f32.mrb[4].mxu1 }
  0xf9   :  { %v186_v46 = vadd.f32 %v185_v44, %v600_v20  ;;  %v259_v47 = vadd.f32 %v258_v45, %v602_v21  ;;  %v187_v48 = vpop.f32.mrb[5].mxu0  ;;  %v260_v49 = vpop.f32.mrb[5].mxu1 }
  0xfa   :  { %v188_v50 = vadd.f32 %v187_v48, %v604_v22  ;;  %v261_v51 = vadd.f32 %v260_v49, %v606_v23  ;;  %v189_v52 = vpop.f32.mrb[6].mxu0  ;;  %v262_v53 = vpop.f32.mrb[6].mxu1 }
  0xfb   :  { %v190_v54 = vadd.f32 %v189_v52, %v600_v20  ;;  %v263_v55 = vadd.f32 %v262_v53, %v602_v21  ;;  %v191_v56 = vpop.f32.mrb[7].mxu0  ;;  %v264_v57 = vpop.f32.mrb[7].mxu1 }
  0xfc   :  { %v456_v58 = vpack.c.bf16 %v188_v50, %v186_v46  ;;  %v457_v59 = vpack.c.bf16 %v261_v51, %v259_v47  ;;  %v192_v60 = vadd.f32 %v191_v56, %v604_v22  ;;  %v265_v61 = vadd.f32 %v264_v57, %v606_v23 }
  0xfe   :  { %387 = vst [vmem:[#allocation5 + $0x20] sm:$0xff] %v456_v58  ;;  %388 = vst [vmem:[#allocation5 + $0x28] sm:$0xff] %v457_v59  ;;  %v458_v62 = vpack.c.bf16 %v192_v60, %v190_v54  ;;  %v459_v63 = vpack.c.bf16 %v265_v61, %v263_v55 }
 0x100   :  { %389 = vst [vmem:[#allocation5 + $0x30] sm:$0xff] %v458_v62  ;;  %390 = vst [vmem:[#allocation5 + $0x38] sm:$0xff] %v459_v63  ;;  %v195_v0 = vpop.f32.mrb[8].mxu0  ;;  %v268_v1 = vpop.f32.mrb[8].mxu1 }
 0x101   :  { %v196_v2 = vadd.f32 %v195_v0, %v600_v20  ;;  %v269_v3 = vadd.f32 %v268_v1, %v602_v21  ;;  %v197_v4 = vpop.f32.mrb[9].mxu0  ;;  %v270_v5 = vpop.f32.mrb[9].mxu1 }
 0x102   :  { %v198_v6 = vadd.f32 %v197_v4, %v604_v22  ;;  %v271_v7 = vadd.f32 %v270_v5, %v606_v23  ;;  %v199_v8 = vpop.f32.mrb[10].mxu0  ;;  %v272_v9 = vpop.f32.mrb[10].mxu1 }
 0x103   :  { %v200_v10 = vadd.f32 %v199_v8, %v600_v20  ;;  %v273_v11 = vadd.f32 %v272_v9, %v602_v21  ;;  %v201_v12 = vpop.f32.mrb[11].mxu0  ;;  %v274_v13 = vpop.f32.mrb[11].mxu1 }
 0x104   :  { %v460_v14 = vpack.c.bf16 %v198_v6, %v196_v2  ;;  %v461_v15 = vpack.c.bf16 %v271_v7, %v269_v3  ;;  %v202_v16 = vadd.f32 %v201_v12, %v604_v22  ;;  %v275_v17 = vadd.f32 %v274_v13, %v606_v23 }
 0x106   :  { %391 = vst [vmem:[#allocation5 + $0x40] sm:$0xff] %v460_v14  ;;  %392 = vst [vmem:[#allocation5 + $0x48] sm:$0xff] %v461_v15  ;;  %v462_v18 = vpack.c.bf16 %v202_v16, %v200_v10  ;;  %v463_v19 = vpack.c.bf16 %v275_v17, %v273_v11 }
 0x108   :  { %393 = vst [vmem:[#allocation5 + $0x50] sm:$0xff] %v462_v18  ;;  %394 = vst [vmem:[#allocation5 + $0x58] sm:$0xff] %v463_v19  ;;  %v205_v24 = vpop.f32.mrb[12].mxu0  ;;  %v278_v25 = vpop.f32.mrb[12].mxu1 }
 0x109   :  { %v206_v26 = vadd.f32 %v205_v24, %v600_v20  ;;  %v279_v27 = vadd.f32 %v278_v25, %v602_v21  ;;  %v207_v28 = vpop.f32.mrb[13].mxu0  ;;  %v280_v29 = vpop.f32.mrb[13].mxu1 }
 0x10a   :  { %v208_v30 = vadd.f32 %v207_v28, %v604_v22  ;;  %v281_v31 = vadd.f32 %v280_v29, %v606_v23  ;;  %v209_v32 = vpop.f32.mrb[14].mxu0  ;;  %v282_v33 = vpop.f32.mrb[14].mxu1 }
 0x10b   :  { %v210_v34 = vadd.f32 %v209_v32, %v600_v20  ;;  %v283_v35 = vadd.f32 %v282_v33, %v602_v21  ;;  %v211_v36 = vpop.f32.mrb[15].mxu0  ;;  %v284_v37 = vpop.f32.mrb[15].mxu1 }
 0x10c   :  { %v464_v38 = vpack.c.bf16 %v208_v30, %v206_v26  ;;  %v465_v39 = vpack.c.bf16 %v281_v31, %v279_v27  ;;  %v212_v40 = vadd.f32 %v211_v36, %v604_v22  ;;  %v285_v41 = vadd.f32 %v284_v37, %v606_v23 }
 0x10e   :  { %395 = vst [vmem:[#allocation5 + $0x60] sm:$0xff] %v464_v38  ;;  %396 = vst [vmem:[#allocation5 + $0x68] sm:$0xff] %v465_v39  ;;  %v466_v42 = vpack.c.bf16 %v212_v40, %v210_v34  ;;  %v467_v43 = vpack.c.bf16 %v285_v41, %v283_v35 }
 0x110   :  { %397 = vst [vmem:[#allocation5 + $0x70] sm:$0xff] %v466_v42  ;;  %398 = vst [vmem:[#allocation5 + $0x78] sm:$0xff] %v467_v43 }
 0x111   :  { %522 = shalt.err (!%p519_p12)
}
 0x112   :  { %s523_s11 = scalar_lea.hbm %s658_s3, 2048 }
 0x113   :  { %p524_p13 = scmp.ne.s32.totalorder %s658_s3, %s523_s11  ;;  %p527_p0 = scmp.lt.u32.totalorder %s523_s11, %s658_s3 }
 0x115   :  { %p529_p1 = pnand %p527_p0, %p524_p13 }
 0x117   :  { %532 = shalt.err (!%p529_p1)
}
 0x118   :  { %410 = dma.vmem_to_hbm [thread:$0]  %s405_s2, 2048, %s658_s3, [#allocation4], %s538_s22, %s538_s22, %s539_s23  }
 0x119   :  { %535 = dma.done.wait [#allocation4], 2048  }
 0x11a   :  { %536 = vsyncadd [#allocation4], 4294965248 }
 0x11b   :  { %414 = vsyncpa [#allocation3], 1 }
 0x11c   :  { %415 = vsyncpa [#allocation4], 1 }

</bundles_post_ra>
